<compile_context>
chip_gen: v7x
topology: tpu7x:2x2x1
jax: 0.10.0
libtpu: 0.0.40
codegen_flags: <defaults>
</compile_context>

<pallas_src>
import numpy as np
import jax
import jax.numpy as jnp
from jax.experimental import pallas as pl
from jax.experimental.pallas import tpu as pltpu

KERNEL_SIZE = 25  # moving-average window (fixed in the PyTorch module)


# --------------------------------------------------------------------------- #
# Kernel: out[b,p,c] = sum_l x[b,l,c] * w_eff[l,p,c] + bias[p,c]
# All operands keep C (the channel block Cb) on the lane axis -> pure VPU MAC.
# --------------------------------------------------------------------------- #
def _dlinear_trend_kernel(x_ref, w_ref, b_ref, o_ref):
    # x_ref: (B, L, Cb)   w_ref: (L, P, Cb)   b_ref: (1, P, Cb)   o_ref: (B, P, Cb)
    L = w_ref.shape[0]
    x = x_ref[...].astype(jnp.float32)            # no-op for f32 inputs
    w = w_ref[...].astype(jnp.float32)
    acc = jnp.broadcast_to(b_ref[...].astype(jnp.float32), o_ref.shape)
    # Static unrolled MAC over the time axis (L is small for DLinear configs).
    # For very long L, switch to lax.fori_loop(..., unroll=8) on the refs.
    for l in range(L):
        acc = acc + x[:, l, :][:, None, :] * w[l, :, :][None, :, :]
    o_ref[...] = acc.astype(o_ref.dtype)


# --------------------------------------------------------------------------- #
# One-time parameter folding (hoisted OUT of the per-forward hot path).
# --------------------------------------------------------------------------- #
def _avg_matrix(L):
    """M[t, l] such that trend[t] = sum_l M[t, l] * x[l]
    (edge-replicate padding + length-K box average, stride 1).
    Built with a tiny numpy loop at init time (no (L,K,L) one-hot)."""
    pad = (KERNEL_SIZE - 1) // 2
    M = np.zeros((L, L), dtype=np.float32)
    for t in range(L):
        for k in range(KERNEL_SIZE):
            M[t, min(max(t + k - pad, 0), L - 1)] += 1.0 / KERNEL_SIZE
    return jnp.asarray(M)


def precompute_params(weight, bias):
    """Fold pad+moving-average into the per-channel linear weight. Call ONCE
    (model init / load), not per forward call.
      weight: [C, P, L], bias: [C, P]  ->  w_eff: [L, P, C], bias_pc: [1, P, C]
    """
    C, P, L = weight.shape
    M = _avg_matrix(L)                                              # (t, l)
    # w_eff[l, p, c] = sum_t M[t, l] * weight[c, p, t]
    w_eff = jnp.einsum("tl,cpt->lpc", M, weight.astype(jnp.float32))
    bias_pc = jnp.transpose(bias.astype(jnp.float32), (1, 0))[None]  # (1, P, C)
    return w_eff, bias_pc


# --------------------------------------------------------------------------- #
# Channel-block (lane) tiling.
# --------------------------------------------------------------------------- #
def _pick_channel_block(C, B, L, P, itemsize, vmem_budget_bytes=12 << 20):
    if C <= 256:
        return C                                   # single lane-dense block
    per_c = itemsize * (B * L + L * P + P + B * P)  # bytes per channel, 1 buffer
    max_cb = max(128, (vmem_budget_bytes // (2 * per_c)) // 128 * 128)
    # Keep >= 2 grid steps (when each block can still be >=128 lanes) so the
    # "parallel" channel axis can be sharded across v7x's 2 TensorCores.
    half = max(128, ((C // 2) // 128) * 128)
    return min(max_cb, half)


# --------------------------------------------------------------------------- #
# Forward wrapper: x [B, L, C] -> [B, P, C]
# --------------------------------------------------------------------------- #
def dlinear_trend(x, w_eff, bias_pc):
    B, L, C = x.shape
    P = w_eff.shape[1]
    itemsize = x.dtype.itemsize

    Cb = _pick_channel_block(C, B, L, P, itemsize)
    n_blocks = pl.cdiv(C, Cb)
    Cpad = n_blocks * Cb
    if Cpad != C:  # divisor-poor channel counts: zero-pad lanes, slice at end
        padc = Cpad - C
        x = jnp.pad(x, ((0, 0), (0, 0), (0, padc)))
        w_eff = jnp.pad(w_eff, ((0, 0), (0, 0), (0, padc)))
        bias_pc = jnp.pad(bias_pc, ((0, 0), (0, 0), (0, padc)))

    cost = pl.CostEstimate(
        flops=2 * B * L * P * Cpad,
        transcendentals=0,
        bytes_accessed=(x.size * x.dtype.itemsize
                        + w_eff.size * w_eff.dtype.itemsize
                        + bias_pc.size * bias_pc.dtype.itemsize
                        + B * P * Cpad * itemsize),
    )

    out = pl.pallas_call(
        _dlinear_trend_kernel,
        out_shape=jax.ShapeDtypeStruct((B, P, Cpad), x.dtype),
        grid=(n_blocks,),
        in_specs=[
            pl.BlockSpec((B, L, Cb), lambda c: (0, 0, c)),
            pl.BlockSpec((L, P, Cb), lambda c: (0, 0, c)),
            pl.BlockSpec((1, P, Cb), lambda c: (0, 0, c)),
        ],
        out_specs=pl.BlockSpec((B, P, Cb), lambda c: (0, 0, c)),
        compiler_params=pltpu.CompilerParams(
            dimension_semantics=("parallel",),
            vmem_limit_bytes=32 << 20),
        cost_estimate=cost,
    )(x, w_eff, bias_pc)

    return out[:, :, :C] if Cpad != C else out


# --------------------------------------------------------------------------- #
# Pure-JAX reference matching the PyTorch forward exactly.
# --------------------------------------------------------------------------- #
def _reference(x, weight, bias):
    pad = (KERNEL_SIZE - 1) // 2
    front = jnp.repeat(x[:, 0:1, :], pad, axis=1)
    end = jnp.repeat(x[:, -1:, :], pad, axis=1)
    xp = jnp.concatenate([front, x, end], axis=1)            # [B, Lp, C]
    L = x.shape[1]
    windows = jnp.stack([xp[:, k:k + L, :] for k in range(KERNEL_SIZE)], axis=0)
    trend = jnp.mean(windows, axis=0)                        # [B, L, C]
    out = jnp.einsum("btc,cpt->bpc", trend, weight) + bias.T[None, :, :]
    return out


if __name__ == "__main__":
    B, L, P, C = 2, 32, 16, 4   # batch, seq_len, pred_len, channels
    key = jax.random.PRNGKey(0)
    kx, kb = jax.random.split(key)

    x = jax.random.normal(kx, (B, L, C), dtype=jnp.float32)

    # Parameters (deterministic):
    #   weight explicitly reset to 1/seq_len * ones([pred_len, seq_len]) per channel
    #   bias keeps nn.Linear's default init ~ U(-1/sqrt(seq_len), 1/sqrt(seq_len))
    weight = jnp.full((C, P, L), 1.0 / L, dtype=jnp.float32)
    bound = 1.0 / (L ** 0.5)
    bias = jax.random.uniform(kb, (C, P), minval=-bound, maxval=bound,
                              dtype=jnp.float32)

    # One-time fold (init-time), then the lane-dense Pallas forward.
    w_eff, bias_pc = precompute_params(weight, bias)
    out = dlinear_trend(x, w_eff, bias_pc)
    out = jax.block_until_ready(out)

    ref = _reference(x, weight, bias)
    assert out.shape == (B, P, C), out.shape
    assert jnp.allclose(out, ref, atol=1e-4, rtol=1e-4), \
        float(jnp.max(jnp.abs(out - ref)))
    print("KERNEL_OK")
</pallas_src>

<mosaic_0001>
module attributes {stable_mosaic.version = 11 : i64} {
  func.func @_dlinear_trend_kernel(%arg0: i32, %arg1: memref<2x32x4xf32, #tpu.memory_space<vmem>>, %arg2: memref<32x16x4xf32, #tpu.memory_space<vmem>>, %arg3: memref<1x16x4xf32, #tpu.memory_space<vmem>>, %arg4: memref<2x16x4xf32, #tpu.memory_space<vmem>>) attributes {dimension_semantics = [#tpu.dimension_semantics<parallel>], iteration_bounds = array<i64: 1>, scalar_prefetch = 0 : i64, scratch_operands = 0 : i64, tpu.core_type = #tpu.core_type<tc>, window_params = [{transform_indices = @transform_0, window_bounds = array<i64: 2, 32, 4>}, {transform_indices = @transform_1, window_bounds = array<i64: 32, 16, 4>}, {transform_indices = @transform_2, window_bounds = array<i64: 1, 16, 4>}, {transform_indices = @transform_3, window_bounds = array<i64: 2, 16, 4>}]} {
    %c0 = arith.constant 0 : index
    %c0_0 = arith.constant 0 : index
    %c0_1 = arith.constant 0 : index
    %0 = vector.load %arg1[%c0, %c0_0, %c0_1] : memref<2x32x4xf32, #tpu.memory_space<vmem>>, vector<2x32x4xf32>
    %c0_2 = arith.constant 0 : index
    %c0_3 = arith.constant 0 : index
    %c0_4 = arith.constant 0 : index
    %1 = vector.load %arg2[%c0_2, %c0_3, %c0_4] : memref<32x16x4xf32, #tpu.memory_space<vmem>>, vector<32x16x4xf32>
    %c0_5 = arith.constant 0 : index
    %c0_6 = arith.constant 0 : index
    %c0_7 = arith.constant 0 : index
    %2 = vector.load %arg3[%c0_5, %c0_6, %c0_7] : memref<1x16x4xf32, #tpu.memory_space<vmem>>, vector<1x16x4xf32>
    %3 = vector.shape_cast %2 : vector<1x16x4xf32> to vector<1x16x4xf32>
    %4 = vector.broadcast %3 : vector<1x16x4xf32> to vector<2x16x4xf32>
    %5 = vector.extract_strided_slice %0 {offsets = [0, 0, 0], sizes = [2, 1, 4], strides = [1, 1, 1]} : vector<2x32x4xf32> to vector<2x1x4xf32>
    %6 = vector.shape_cast %5 : vector<2x1x4xf32> to vector<2x4xf32>
    %7 = vector.shape_cast %6 : vector<2x4xf32> to vector<2x1x4xf32>
    %8 = vector.extract_strided_slice %1 {offsets = [0, 0, 0], sizes = [1, 16, 4], strides = [1, 1, 1]} : vector<32x16x4xf32> to vector<1x16x4xf32>
    %9 = vector.shape_cast %8 : vector<1x16x4xf32> to vector<16x4xf32>
    %10 = vector.shape_cast %9 : vector<16x4xf32> to vector<1x16x4xf32>
    %11 = vector.broadcast %7 : vector<2x1x4xf32> to vector<2x16x4xf32>
    %12 = vector.broadcast %10 : vector<1x16x4xf32> to vector<2x16x4xf32>
    %13 = arith.mulf %11, %12 : vector<2x16x4xf32>
    %14 = arith.addf %4, %13 : vector<2x16x4xf32>
    %15 = vector.extract_strided_slice %0 {offsets = [0, 1, 0], sizes = [2, 1, 4], strides = [1, 1, 1]} : vector<2x32x4xf32> to vector<2x1x4xf32>
    %16 = vector.shape_cast %15 : vector<2x1x4xf32> to vector<2x4xf32>
    %17 = vector.shape_cast %16 : vector<2x4xf32> to vector<2x1x4xf32>
    %18 = vector.extract_strided_slice %1 {offsets = [1, 0, 0], sizes = [1, 16, 4], strides = [1, 1, 1]} : vector<32x16x4xf32> to vector<1x16x4xf32>
    %19 = vector.shape_cast %18 : vector<1x16x4xf32> to vector<16x4xf32>
    %20 = vector.shape_cast %19 : vector<16x4xf32> to vector<1x16x4xf32>
    %21 = vector.broadcast %17 : vector<2x1x4xf32> to vector<2x16x4xf32>
    %22 = vector.broadcast %20 : vector<1x16x4xf32> to vector<2x16x4xf32>
    %23 = arith.mulf %21, %22 : vector<2x16x4xf32>
    %24 = arith.addf %14, %23 : vector<2x16x4xf32>
    %25 = vector.extract_strided_slice %0 {offsets = [0, 2, 0], sizes = [2, 1, 4], strides = [1, 1, 1]} : vector<2x32x4xf32> to vector<2x1x4xf32>
    %26 = vector.shape_cast %25 : vector<2x1x4xf32> to vector<2x4xf32>
    %27 = vector.shape_cast %26 : vector<2x4xf32> to vector<2x1x4xf32>
    %28 = vector.extract_strided_slice %1 {offsets = [2, 0, 0], sizes = [1, 16, 4], strides = [1, 1, 1]} : vector<32x16x4xf32> to vector<1x16x4xf32>
    %29 = vector.shape_cast %28 : vector<1x16x4xf32> to vector<16x4xf32>
    %30 = vector.shape_cast %29 : vector<16x4xf32> to vector<1x16x4xf32>
    %31 = vector.broadcast %27 : vector<2x1x4xf32> to vector<2x16x4xf32>
    %32 = vector.broadcast %30 : vector<1x16x4xf32> to vector<2x16x4xf32>
    %33 = arith.mulf %31, %32 : vector<2x16x4xf32>
    %34 = arith.addf %24, %33 : vector<2x16x4xf32>
    %35 = vector.extract_strided_slice %0 {offsets = [0, 3, 0], sizes = [2, 1, 4], strides = [1, 1, 1]} : vector<2x32x4xf32> to vector<2x1x4xf32>
    %36 = vector.shape_cast %35 : vector<2x1x4xf32> to vector<2x4xf32>
    %37 = vector.shape_cast %36 : vector<2x4xf32> to vector<2x1x4xf32>
    %38 = vector.extract_strided_slice %1 {offsets = [3, 0, 0], sizes = [1, 16, 4], strides = [1, 1, 1]} : vector<32x16x4xf32> to vector<1x16x4xf32>
    %39 = vector.shape_cast %38 : vector<1x16x4xf32> to vector<16x4xf32>
    %40 = vector.shape_cast %39 : vector<16x4xf32> to vector<1x16x4xf32>
    %41 = vector.broadcast %37 : vector<2x1x4xf32> to vector<2x16x4xf32>
    %42 = vector.broadcast %40 : vector<1x16x4xf32> to vector<2x16x4xf32>
    %43 = arith.mulf %41, %42 : vector<2x16x4xf32>
    %44 = arith.addf %34, %43 : vector<2x16x4xf32>
    %45 = vector.extract_strided_slice %0 {offsets = [0, 4, 0], sizes = [2, 1, 4], strides = [1, 1, 1]} : vector<2x32x4xf32> to vector<2x1x4xf32>
    %46 = vector.shape_cast %45 : vector<2x1x4xf32> to vector<2x4xf32>
    %47 = vector.shape_cast %46 : vector<2x4xf32> to vector<2x1x4xf32>
    %48 = vector.extract_strided_slice %1 {offsets = [4, 0, 0], sizes = [1, 16, 4], strides = [1, 1, 1]} : vector<32x16x4xf32> to vector<1x16x4xf32>
    %49 = vector.shape_cast %48 : vector<1x16x4xf32> to vector<16x4xf32>
    %50 = vector.shape_cast %49 : vector<16x4xf32> to vector<1x16x4xf32>
    %51 = vector.broadcast %47 : vector<2x1x4xf32> to vector<2x16x4xf32>
    %52 = vector.broadcast %50 : vector<1x16x4xf32> to vector<2x16x4xf32>
    %53 = arith.mulf %51, %52 : vector<2x16x4xf32>
    %54 = arith.addf %44, %53 : vector<2x16x4xf32>
    %55 = vector.extract_strided_slice %0 {offsets = [0, 5, 0], sizes = [2, 1, 4], strides = [1, 1, 1]} : vector<2x32x4xf32> to vector<2x1x4xf32>
    %56 = vector.shape_cast %55 : vector<2x1x4xf32> to vector<2x4xf32>
    %57 = vector.shape_cast %56 : vector<2x4xf32> to vector<2x1x4xf32>
    %58 = vector.extract_strided_slice %1 {offsets = [5, 0, 0], sizes = [1, 16, 4], strides = [1, 1, 1]} : vector<32x16x4xf32> to vector<1x16x4xf32>
    %59 = vector.shape_cast %58 : vector<1x16x4xf32> to vector<16x4xf32>
    %60 = vector.shape_cast %59 : vector<16x4xf32> to vector<1x16x4xf32>
    %61 = vector.broadcast %57 : vector<2x1x4xf32> to vector<2x16x4xf32>
    %62 = vector.broadcast %60 : vector<1x16x4xf32> to vector<2x16x4xf32>
    %63 = arith.mulf %61, %62 : vector<2x16x4xf32>
    %64 = arith.addf %54, %63 : vector<2x16x4xf32>
    %65 = vector.extract_strided_slice %0 {offsets = [0, 6, 0], sizes = [2, 1, 4], strides = [1, 1, 1]} : vector<2x32x4xf32> to vector<2x1x4xf32>
    %66 = vector.shape_cast %65 : vector<2x1x4xf32> to vector<2x4xf32>
    %67 = vector.shape_cast %66 : vector<2x4xf32> to vector<2x1x4xf32>
    %68 = vector.extract_strided_slice %1 {offsets = [6, 0, 0], sizes = [1, 16, 4], strides = [1, 1, 1]} : vector<32x16x4xf32> to vector<1x16x4xf32>
    %69 = vector.shape_cast %68 : vector<1x16x4xf32> to vector<16x4xf32>
    %70 = vector.shape_cast %69 : vector<16x4xf32> to vector<1x16x4xf32>
    %71 = vector.broadcast %67 : vector<2x1x4xf32> to vector<2x16x4xf32>
    %72 = vector.broadcast %70 : vector<1x16x4xf32> to vector<2x16x4xf32>
    %73 = arith.mulf %71, %72 : vector<2x16x4xf32>
    %74 = arith.addf %64, %73 : vector<2x16x4xf32>
    %75 = vector.extract_strided_slice %0 {offsets = [0, 7, 0], sizes = [2, 1, 4], strides = [1, 1, 1]} : vector<2x32x4xf32> to vector<2x1x4xf32>
    %76 = vector.shape_cast %75 : vector<2x1x4xf32> to vector<2x4xf32>
    %77 = vector.shape_cast %76 : vector<2x4xf32> to vector<2x1x4xf32>
    %78 = vector.extract_strided_slice %1 {offsets = [7, 0, 0], sizes = [1, 16, 4], strides = [1, 1, 1]} : vector<32x16x4xf32> to vector<1x16x4xf32>
    %79 = vector.shape_cast %78 : vector<1x16x4xf32> to vector<16x4xf32>
    %80 = vector.shape_cast %79 : vector<16x4xf32> to vector<1x16x4xf32>
    %81 = vector.broadcast %77 : vector<2x1x4xf32> to vector<2x16x4xf32>
    %82 = vector.broadcast %80 : vector<1x16x4xf32> to vector<2x16x4xf32>
    %83 = arith.mulf %81, %82 : vector<2x16x4xf32>
    %84 = arith.addf %74, %83 : vector<2x16x4xf32>
    %85 = vector.extract_strided_slice %0 {offsets = [0, 8, 0], sizes = [2, 1, 4], strides = [1, 1, 1]} : vector<2x32x4xf32> to vector<2x1x4xf32>
    %86 = vector.shape_cast %85 : vector<2x1x4xf32> to vector<2x4xf32>
    %87 = vector.shape_cast %86 : vector<2x4xf32> to vector<2x1x4xf32>
    %88 = vector.extract_strided_slice %1 {offsets = [8, 0, 0], sizes = [1, 16, 4], strides = [1, 1, 1]} : vector<32x16x4xf32> to vector<1x16x4xf32>
    %89 = vector.shape_cast %88 : vector<1x16x4xf32> to vector<16x4xf32>
    %90 = vector.shape_cast %89 : vector<16x4xf32> to vector<1x16x4xf32>
    %91 = vector.broadcast %87 : vector<2x1x4xf32> to vector<2x16x4xf32>
    %92 = vector.broadcast %90 : vector<1x16x4xf32> to vector<2x16x4xf32>
    %93 = arith.mulf %91, %92 : vector<2x16x4xf32>
    %94 = arith.addf %84, %93 : vector<2x16x4xf32>
    %95 = vector.extract_strided_slice %0 {offsets = [0, 9, 0], sizes = [2, 1, 4], strides = [1, 1, 1]} : vector<2x32x4xf32> to vector<2x1x4xf32>
    %96 = vector.shape_cast %95 : vector<2x1x4xf32> to vector<2x4xf32>
    %97 = vector.shape_cast %96 : vector<2x4xf32> to vector<2x1x4xf32>
    %98 = vector.extract_strided_slice %1 {offsets = [9, 0, 0], sizes = [1, 16, 4], strides = [1, 1, 1]} : vector<32x16x4xf32> to vector<1x16x4xf32>
    %99 = vector.shape_cast %98 : vector<1x16x4xf32> to vector<16x4xf32>
    %100 = vector.shape_cast %99 : vector<16x4xf32> to vector<1x16x4xf32>
    %101 = vector.broadcast %97 : vector<2x1x4xf32> to vector<2x16x4xf32>
    %102 = vector.broadcast %100 : vector<1x16x4xf32> to vector<2x16x4xf32>
    %103 = arith.mulf %101, %102 : vector<2x16x4xf32>
    %104 = arith.addf %94, %103 : vector<2x16x4xf32>
    %105 = vector.extract_strided_slice %0 {offsets = [0, 10, 0], sizes = [2, 1, 4], strides = [1, 1, 1]} : vector<2x32x4xf32> to vector<2x1x4xf32>
    %106 = vector.shape_cast %105 : vector<2x1x4xf32> to vector<2x4xf32>
    %107 = vector.shape_cast %106 : vector<2x4xf32> to vector<2x1x4xf32>
    %108 = vector.extract_strided_slice %1 {offsets = [10, 0, 0], sizes = [1, 16, 4], strides = [1, 1, 1]} : vector<32x16x4xf32> to vector<1x16x4xf32>
    %109 = vector.shape_cast %108 : vector<1x16x4xf32> to vector<16x4xf32>
    %110 = vector.shape_cast %109 : vector<16x4xf32> to vector<1x16x4xf32>
    %111 = vector.broadcast %107 : vector<2x1x4xf32> to vector<2x16x4xf32>
    %112 = vector.broadcast %110 : vector<1x16x4xf32> to vector<2x16x4xf32>
    %113 = arith.mulf %111, %112 : vector<2x16x4xf32>
    %114 = arith.addf %104, %113 : vector<2x16x4xf32>
    %115 = vector.extract_strided_slice %0 {offsets = [0, 11, 0], sizes = [2, 1, 4], strides = [1, 1, 1]} : vector<2x32x4xf32> to vector<2x1x4xf32>
    %116 = vector.shape_cast %115 : vector<2x1x4xf32> to vector<2x4xf32>
    %117 = vector.shape_cast %116 : vector<2x4xf32> to vector<2x1x4xf32>
    %118 = vector.extract_strided_slice %1 {offsets = [11, 0, 0], sizes = [1, 16, 4], strides = [1, 1, 1]} : vector<32x16x4xf32> to vector<1x16x4xf32>
    %119 = vector.shape_cast %118 : vector<1x16x4xf32> to vector<16x4xf32>
    %120 = vector.shape_cast %119 : vector<16x4xf32> to vector<1x16x4xf32>
    %121 = vector.broadcast %117 : vector<2x1x4xf32> to vector<2x16x4xf32>
    %122 = vector.broadcast %120 : vector<1x16x4xf32> to vector<2x16x4xf32>
    %123 = arith.mulf %121, %122 : vector<2x16x4xf32>
    %124 = arith.addf %114, %123 : vector<2x16x4xf32>
    %125 = vector.extract_strided_slice %0 {offsets = [0, 12, 0], sizes = [2, 1, 4], strides = [1, 1, 1]} : vector<2x32x4xf32> to vector<2x1x4xf32>
    %126 = vector.shape_cast %125 : vector<2x1x4xf32> to vector<2x4xf32>
    %127 = vector.shape_cast %126 : vector<2x4xf32> to vector<2x1x4xf32>
    %128 = vector.extract_strided_slice %1 {offsets = [12, 0, 0], sizes = [1, 16, 4], strides = [1, 1, 1]} : vector<32x16x4xf32> to vector<1x16x4xf32>
    %129 = vector.shape_cast %128 : vector<1x16x4xf32> to vector<16x4xf32>
    %130 = vector.shape_cast %129 : vector<16x4xf32> to vector<1x16x4xf32>
    %131 = vector.broadcast %127 : vector<2x1x4xf32> to vector<2x16x4xf32>
    %132 = vector.broadcast %130 : vector<1x16x4xf32> to vector<2x16x4xf32>
    %133 = arith.mulf %131, %132 : vector<2x16x4xf32>
    %134 = arith.addf %124, %133 : vector<2x16x4xf32>
    %135 = vector.extract_strided_slice %0 {offsets = [0, 13, 0], sizes = [2, 1, 4], strides = [1, 1, 1]} : vector<2x32x4xf32> to vector<2x1x4xf32>
    %136 = vector.shape_cast %135 : vector<2x1x4xf32> to vector<2x4xf32>
    %137 = vector.shape_cast %136 : vector<2x4xf32> to vector<2x1x4xf32>
    %138 = vector.extract_strided_slice %1 {offsets = [13, 0, 0], sizes = [1, 16, 4], strides = [1, 1, 1]} : vector<32x16x4xf32> to vector<1x16x4xf32>
    %139 = vector.shape_cast %138 : vector<1x16x4xf32> to vector<16x4xf32>
    %140 = vector.shape_cast %139 : vector<16x4xf32> to vector<1x16x4xf32>
    %141 = vector.broadcast %137 : vector<2x1x4xf32> to vector<2x16x4xf32>
    %142 = vector.broadcast %140 : vector<1x16x4xf32> to vector<2x16x4xf32>
    %143 = arith.mulf %141, %142 : vector<2x16x4xf32>
    %144 = arith.addf %134, %143 : vector<2x16x4xf32>
    %145 = vector.extract_strided_slice %0 {offsets = [0, 14, 0], sizes = [2, 1, 4], strides = [1, 1, 1]} : vector<2x32x4xf32> to vector<2x1x4xf32>
    %146 = vector.shape_cast %145 : vector<2x1x4xf32> to vector<2x4xf32>
    %147 = vector.shape_cast %146 : vector<2x4xf32> to vector<2x1x4xf32>
    %148 = vector.extract_strided_slice %1 {offsets = [14, 0, 0], sizes = [1, 16, 4], strides = [1, 1, 1]} : vector<32x16x4xf32> to vector<1x16x4xf32>
    %149 = vector.shape_cast %148 : vector<1x16x4xf32> to vector<16x4xf32>
    %150 = vector.shape_cast %149 : vector<16x4xf32> to vector<1x16x4xf32>
    %151 = vector.broadcast %147 : vector<2x1x4xf32> to vector<2x16x4xf32>
    %152 = vector.broadcast %150 : vector<1x16x4xf32> to vector<2x16x4xf32>
    %153 = arith.mulf %151, %152 : vector<2x16x4xf32>
    %154 = arith.addf %144, %153 : vector<2x16x4xf32>
    %155 = vector.extract_strided_slice %0 {offsets = [0, 15, 0], sizes = [2, 1, 4], strides = [1, 1, 1]} : vector<2x32x4xf32> to vector<2x1x4xf32>
    %156 = vector.shape_cast %155 : vector<2x1x4xf32> to vector<2x4xf32>
    %157 = vector.shape_cast %156 : vector<2x4xf32> to vector<2x1x4xf32>
    %158 = vector.extract_strided_slice %1 {offsets = [15, 0, 0], sizes = [1, 16, 4], strides = [1, 1, 1]} : vector<32x16x4xf32> to vector<1x16x4xf32>
    %159 = vector.shape_cast %158 : vector<1x16x4xf32> to vector<16x4xf32>
    %160 = vector.shape_cast %159 : vector<16x4xf32> to vector<1x16x4xf32>
    %161 = vector.broadcast %157 : vector<2x1x4xf32> to vector<2x16x4xf32>
    %162 = vector.broadcast %160 : vector<1x16x4xf32> to vector<2x16x4xf32>
    %163 = arith.mulf %161, %162 : vector<2x16x4xf32>
    %164 = arith.addf %154, %163 : vector<2x16x4xf32>
    %165 = vector.extract_strided_slice %0 {offsets = [0, 16, 0], sizes = [2, 1, 4], strides = [1, 1, 1]} : vector<2x32x4xf32> to vector<2x1x4xf32>
    %166 = vector.shape_cast %165 : vector<2x1x4xf32> to vector<2x4xf32>
    %167 = vector.shape_cast %166 : vector<2x4xf32> to vector<2x1x4xf32>
    %168 = vector.extract_strided_slice %1 {offsets = [16, 0, 0], sizes = [1, 16, 4], strides = [1, 1, 1]} : vector<32x16x4xf32> to vector<1x16x4xf32>
    %169 = vector.shape_cast %168 : vector<1x16x4xf32> to vector<16x4xf32>
    %170 = vector.shape_cast %169 : vector<16x4xf32> to vector<1x16x4xf32>
    %171 = vector.broadcast %167 : vector<2x1x4xf32> to vector<2x16x4xf32>
    %172 = vector.broadcast %170 : vector<1x16x4xf32> to vector<2x16x4xf32>
    %173 = arith.mulf %171, %172 : vector<2x16x4xf32>
    %174 = arith.addf %164, %173 : vector<2x16x4xf32>
    %175 = vector.extract_strided_slice %0 {offsets = [0, 17, 0], sizes = [2, 1, 4], strides = [1, 1, 1]} : vector<2x32x4xf32> to vector<2x1x4xf32>
    %176 = vector.shape_cast %175 : vector<2x1x4xf32> to vector<2x4xf32>
    %177 = vector.shape_cast %176 : vector<2x4xf32> to vector<2x1x4xf32>
    %178 = vector.extract_strided_slice %1 {offsets = [17, 0, 0], sizes = [1, 16, 4], strides = [1, 1, 1]} : vector<32x16x4xf32> to vector<1x16x4xf32>
    %179 = vector.shape_cast %178 : vector<1x16x4xf32> to vector<16x4xf32>
    %180 = vector.shape_cast %179 : vector<16x4xf32> to vector<1x16x4xf32>
    %181 = vector.broadcast %177 : vector<2x1x4xf32> to vector<2x16x4xf32>
    %182 = vector.broadcast %180 : vector<1x16x4xf32> to vector<2x16x4xf32>
    %183 = arith.mulf %181, %182 : vector<2x16x4xf32>
    %184 = arith.addf %174, %183 : vector<2x16x4xf32>
    %185 = vector.extract_strided_slice %0 {offsets = [0, 18, 0], sizes = [2, 1, 4], strides = [1, 1, 1]} : vector<2x32x4xf32> to vector<2x1x4xf32>
    %186 = vector.shape_cast %185 : vector<2x1x4xf32> to vector<2x4xf32>
    %187 = vector.shape_cast %186 : vector<2x4xf32> to vector<2x1x4xf32>
    %188 = vector.extract_strided_slice %1 {offsets = [18, 0, 0], sizes = [1, 16, 4], strides = [1, 1, 1]} : vector<32x16x4xf32> to vector<1x16x4xf32>
    %189 = vector.shape_cast %188 : vector<1x16x4xf32> to vector<16x4xf32>
    %190 = vector.shape_cast %189 : vector<16x4xf32> to vector<1x16x4xf32>
    %191 = vector.broadcast %187 : vector<2x1x4xf32> to vector<2x16x4xf32>
    %192 = vector.broadcast %190 : vector<1x16x4xf32> to vector<2x16x4xf32>
    %193 = arith.mulf %191, %192 : vector<2x16x4xf32>
    %194 = arith.addf %184, %193 : vector<2x16x4xf32>
    %195 = vector.extract_strided_slice %0 {offsets = [0, 19, 0], sizes = [2, 1, 4], strides = [1, 1, 1]} : vector<2x32x4xf32> to vector<2x1x4xf32>
    %196 = vector.shape_cast %195 : vector<2x1x4xf32> to vector<2x4xf32>
    %197 = vector.shape_cast %196 : vector<2x4xf32> to vector<2x1x4xf32>
    %198 = vector.extract_strided_slice %1 {offsets = [19, 0, 0], sizes = [1, 16, 4], strides = [1, 1, 1]} : vector<32x16x4xf32> to vector<1x16x4xf32>
    %199 = vector.shape_cast %198 : vector<1x16x4xf32> to vector<16x4xf32>
    %200 = vector.shape_cast %199 : vector<16x4xf32> to vector<1x16x4xf32>
    %201 = vector.broadcast %197 : vector<2x1x4xf32> to vector<2x16x4xf32>
    %202 = vector.broadcast %200 : vector<1x16x4xf32> to vector<2x16x4xf32>
    %203 = arith.mulf %201, %202 : vector<2x16x4xf32>
    %204 = arith.addf %194, %203 : vector<2x16x4xf32>
    %205 = vector.extract_strided_slice %0 {offsets = [0, 20, 0], sizes = [2, 1, 4], strides = [1, 1, 1]} : vector<2x32x4xf32> to vector<2x1x4xf32>
    %206 = vector.shape_cast %205 : vector<2x1x4xf32> to vector<2x4xf32>
    %207 = vector.shape_cast %206 : vector<2x4xf32> to vector<2x1x4xf32>
    %208 = vector.extract_strided_slice %1 {offsets = [20, 0, 0], sizes = [1, 16, 4], strides = [1, 1, 1]} : vector<32x16x4xf32> to vector<1x16x4xf32>
    %209 = vector.shape_cast %208 : vector<1x16x4xf32> to vector<16x4xf32>
    %210 = vector.shape_cast %209 : vector<16x4xf32> to vector<1x16x4xf32>
    %211 = vector.broadcast %207 : vector<2x1x4xf32> to vector<2x16x4xf32>
    %212 = vector.broadcast %210 : vector<1x16x4xf32> to vector<2x16x4xf32>
    %213 = arith.mulf %211, %212 : vector<2x16x4xf32>
    %214 = arith.addf %204, %213 : vector<2x16x4xf32>
    %215 = vector.extract_strided_slice %0 {offsets = [0, 21, 0], sizes = [2, 1, 4], strides = [1, 1, 1]} : vector<2x32x4xf32> to vector<2x1x4xf32>
    %216 = vector.shape_cast %215 : vector<2x1x4xf32> to vector<2x4xf32>
    %217 = vector.shape_cast %216 : vector<2x4xf32> to vector<2x1x4xf32>
    %218 = vector.extract_strided_slice %1 {offsets = [21, 0, 0], sizes = [1, 16, 4], strides = [1, 1, 1]} : vector<32x16x4xf32> to vector<1x16x4xf32>
    %219 = vector.shape_cast %218 : vector<1x16x4xf32> to vector<16x4xf32>
    %220 = vector.shape_cast %219 : vector<16x4xf32> to vector<1x16x4xf32>
    %221 = vector.broadcast %217 : vector<2x1x4xf32> to vector<2x16x4xf32>
    %222 = vector.broadcast %220 : vector<1x16x4xf32> to vector<2x16x4xf32>
    %223 = arith.mulf %221, %222 : vector<2x16x4xf32>
    %224 = arith.addf %214, %223 : vector<2x16x4xf32>
    %225 = vector.extract_strided_slice %0 {offsets = [0, 22, 0], sizes = [2, 1, 4], strides = [1, 1, 1]} : vector<2x32x4xf32> to vector<2x1x4xf32>
    %226 = vector.shape_cast %225 : vector<2x1x4xf32> to vector<2x4xf32>
    %227 = vector.shape_cast %226 : vector<2x4xf32> to vector<2x1x4xf32>
    %228 = vector.extract_strided_slice %1 {offsets = [22, 0, 0], sizes = [1, 16, 4], strides = [1, 1, 1]} : vector<32x16x4xf32> to vector<1x16x4xf32>
    %229 = vector.shape_cast %228 : vector<1x16x4xf32> to vector<16x4xf32>
    %230 = vector.shape_cast %229 : vector<16x4xf32> to vector<1x16x4xf32>
    %231 = vector.broadcast %227 : vector<2x1x4xf32> to vector<2x16x4xf32>
    %232 = vector.broadcast %230 : vector<1x16x4xf32> to vector<2x16x4xf32>
    %233 = arith.mulf %231, %232 : vector<2x16x4xf32>
    %234 = arith.addf %224, %233 : vector<2x16x4xf32>
    %235 = vector.extract_strided_slice %0 {offsets = [0, 23, 0], sizes = [2, 1, 4], strides = [1, 1, 1]} : vector<2x32x4xf32> to vector<2x1x4xf32>
    %236 = vector.shape_cast %235 : vector<2x1x4xf32> to vector<2x4xf32>
    %237 = vector.shape_cast %236 : vector<2x4xf32> to vector<2x1x4xf32>
    %238 = vector.extract_strided_slice %1 {offsets = [23, 0, 0], sizes = [1, 16, 4], strides = [1, 1, 1]} : vector<32x16x4xf32> to vector<1x16x4xf32>
    %239 = vector.shape_cast %238 : vector<1x16x4xf32> to vector<16x4xf32>
    %240 = vector.shape_cast %239 : vector<16x4xf32> to vector<1x16x4xf32>
    %241 = vector.broadcast %237 : vector<2x1x4xf32> to vector<2x16x4xf32>
    %242 = vector.broadcast %240 : vector<1x16x4xf32> to vector<2x16x4xf32>
    %243 = arith.mulf %241, %242 : vector<2x16x4xf32>
    %244 = arith.addf %234, %243 : vector<2x16x4xf32>
    %245 = vector.extract_strided_slice %0 {offsets = [0, 24, 0], sizes = [2, 1, 4], strides = [1, 1, 1]} : vector<2x32x4xf32> to vector<2x1x4xf32>
    %246 = vector.shape_cast %245 : vector<2x1x4xf32> to vector<2x4xf32>
    %247 = vector.shape_cast %246 : vector<2x4xf32> to vector<2x1x4xf32>
    %248 = vector.extract_strided_slice %1 {offsets = [24, 0, 0], sizes = [1, 16, 4], strides = [1, 1, 1]} : vector<32x16x4xf32> to vector<1x16x4xf32>
    %249 = vector.shape_cast %248 : vector<1x16x4xf32> to vector<16x4xf32>
    %250 = vector.shape_cast %249 : vector<16x4xf32> to vector<1x16x4xf32>
    %251 = vector.broadcast %247 : vector<2x1x4xf32> to vector<2x16x4xf32>
    %252 = vector.broadcast %250 : vector<1x16x4xf32> to vector<2x16x4xf32>
    %253 = arith.mulf %251, %252 : vector<2x16x4xf32>
    %254 = arith.addf %244, %253 : vector<2x16x4xf32>
    %255 = vector.extract_strided_slice %0 {offsets = [0, 25, 0], sizes = [2, 1, 4], strides = [1, 1, 1]} : vector<2x32x4xf32> to vector<2x1x4xf32>
    %256 = vector.shape_cast %255 : vector<2x1x4xf32> to vector<2x4xf32>
    %257 = vector.shape_cast %256 : vector<2x4xf32> to vector<2x1x4xf32>
    %258 = vector.extract_strided_slice %1 {offsets = [25, 0, 0], sizes = [1, 16, 4], strides = [1, 1, 1]} : vector<32x16x4xf32> to vector<1x16x4xf32>
    %259 = vector.shape_cast %258 : vector<1x16x4xf32> to vector<16x4xf32>
    %260 = vector.shape_cast %259 : vector<16x4xf32> to vector<1x16x4xf32>
    %261 = vector.broadcast %257 : vector<2x1x4xf32> to vector<2x16x4xf32>
    %262 = vector.broadcast %260 : vector<1x16x4xf32> to vector<2x16x4xf32>
    %263 = arith.mulf %261, %262 : vector<2x16x4xf32>
    %264 = arith.addf %254, %263 : vector<2x16x4xf32>
    %265 = vector.extract_strided_slice %0 {offsets = [0, 26, 0], sizes = [2, 1, 4], strides = [1, 1, 1]} : vector<2x32x4xf32> to vector<2x1x4xf32>
    %266 = vector.shape_cast %265 : vector<2x1x4xf32> to vector<2x4xf32>
    %267 = vector.shape_cast %266 : vector<2x4xf32> to vector<2x1x4xf32>
    %268 = vector.extract_strided_slice %1 {offsets = [26, 0, 0], sizes = [1, 16, 4], strides = [1, 1, 1]} : vector<32x16x4xf32> to vector<1x16x4xf32>
    %269 = vector.shape_cast %268 : vector<1x16x4xf32> to vector<16x4xf32>
    %270 = vector.shape_cast %269 : vector<16x4xf32> to vector<1x16x4xf32>
    %271 = vector.broadcast %267 : vector<2x1x4xf32> to vector<2x16x4xf32>
    %272 = vector.broadcast %270 : vector<1x16x4xf32> to vector<2x16x4xf32>
    %273 = arith.mulf %271, %272 : vector<2x16x4xf32>
    %274 = arith.addf %264, %273 : vector<2x16x4xf32>
    %275 = vector.extract_strided_slice %0 {offsets = [0, 27, 0], sizes = [2, 1, 4], strides = [1, 1, 1]} : vector<2x32x4xf32> to vector<2x1x4xf32>
    %276 = vector.shape_cast %275 : vector<2x1x4xf32> to vector<2x4xf32>
    %277 = vector.shape_cast %276 : vector<2x4xf32> to vector<2x1x4xf32>
    %278 = vector.extract_strided_slice %1 {offsets = [27, 0, 0], sizes = [1, 16, 4], strides = [1, 1, 1]} : vector<32x16x4xf32> to vector<1x16x4xf32>
    %279 = vector.shape_cast %278 : vector<1x16x4xf32> to vector<16x4xf32>
    %280 = vector.shape_cast %279 : vector<16x4xf32> to vector<1x16x4xf32>
    %281 = vector.broadcast %277 : vector<2x1x4xf32> to vector<2x16x4xf32>
    %282 = vector.broadcast %280 : vector<1x16x4xf32> to vector<2x16x4xf32>
    %283 = arith.mulf %281, %282 : vector<2x16x4xf32>
    %284 = arith.addf %274, %283 : vector<2x16x4xf32>
    %285 = vector.extract_strided_slice %0 {offsets = [0, 28, 0], sizes = [2, 1, 4], strides = [1, 1, 1]} : vector<2x32x4xf32> to vector<2x1x4xf32>
    %286 = vector.shape_cast %285 : vector<2x1x4xf32> to vector<2x4xf32>
    %287 = vector.shape_cast %286 : vector<2x4xf32> to vector<2x1x4xf32>
    %288 = vector.extract_strided_slice %1 {offsets = [28, 0, 0], sizes = [1, 16, 4], strides = [1, 1, 1]} : vector<32x16x4xf32> to vector<1x16x4xf32>
    %289 = vector.shape_cast %288 : vector<1x16x4xf32> to vector<16x4xf32>
    %290 = vector.shape_cast %289 : vector<16x4xf32> to vector<1x16x4xf32>
    %291 = vector.broadcast %287 : vector<2x1x4xf32> to vector<2x16x4xf32>
    %292 = vector.broadcast %290 : vector<1x16x4xf32> to vector<2x16x4xf32>
    %293 = arith.mulf %291, %292 : vector<2x16x4xf32>
    %294 = arith.addf %284, %293 : vector<2x16x4xf32>
    %295 = vector.extract_strided_slice %0 {offsets = [0, 29, 0], sizes = [2, 1, 4], strides = [1, 1, 1]} : vector<2x32x4xf32> to vector<2x1x4xf32>
    %296 = vector.shape_cast %295 : vector<2x1x4xf32> to vector<2x4xf32>
    %297 = vector.shape_cast %296 : vector<2x4xf32> to vector<2x1x4xf32>
    %298 = vector.extract_strided_slice %1 {offsets = [29, 0, 0], sizes = [1, 16, 4], strides = [1, 1, 1]} : vector<32x16x4xf32> to vector<1x16x4xf32>
    %299 = vector.shape_cast %298 : vector<1x16x4xf32> to vector<16x4xf32>
    %300 = vector.shape_cast %299 : vector<16x4xf32> to vector<1x16x4xf32>
    %301 = vector.broadcast %297 : vector<2x1x4xf32> to vector<2x16x4xf32>
    %302 = vector.broadcast %300 : vector<1x16x4xf32> to vector<2x16x4xf32>
    %303 = arith.mulf %301, %302 : vector<2x16x4xf32>
    %304 = arith.addf %294, %303 : vector<2x16x4xf32>
    %305 = vector.extract_strided_slice %0 {offsets = [0, 30, 0], sizes = [2, 1, 4], strides = [1, 1, 1]} : vector<2x32x4xf32> to vector<2x1x4xf32>
    %306 = vector.shape_cast %305 : vector<2x1x4xf32> to vector<2x4xf32>
    %307 = vector.shape_cast %306 : vector<2x4xf32> to vector<2x1x4xf32>
    %308 = vector.extract_strided_slice %1 {offsets = [30, 0, 0], sizes = [1, 16, 4], strides = [1, 1, 1]} : vector<32x16x4xf32> to vector<1x16x4xf32>
    %309 = vector.shape_cast %308 : vector<1x16x4xf32> to vector<16x4xf32>
    %310 = vector.shape_cast %309 : vector<16x4xf32> to vector<1x16x4xf32>
    %311 = vector.broadcast %307 : vector<2x1x4xf32> to vector<2x16x4xf32>
    %312 = vector.broadcast %310 : vector<1x16x4xf32> to vector<2x16x4xf32>
    %313 = arith.mulf %311, %312 : vector<2x16x4xf32>
    %314 = arith.addf %304, %313 : vector<2x16x4xf32>
    %315 = vector.extract_strided_slice %0 {offsets = [0, 31, 0], sizes = [2, 1, 4], strides = [1, 1, 1]} : vector<2x32x4xf32> to vector<2x1x4xf32>
    %316 = vector.shape_cast %315 : vector<2x1x4xf32> to vector<2x4xf32>
    %317 = vector.shape_cast %316 : vector<2x4xf32> to vector<2x1x4xf32>
    %318 = vector.extract_strided_slice %1 {offsets = [31, 0, 0], sizes = [1, 16, 4], strides = [1, 1, 1]} : vector<32x16x4xf32> to vector<1x16x4xf32>
    %319 = vector.shape_cast %318 : vector<1x16x4xf32> to vector<16x4xf32>
    %320 = vector.shape_cast %319 : vector<16x4xf32> to vector<1x16x4xf32>
    %321 = vector.broadcast %317 : vector<2x1x4xf32> to vector<2x16x4xf32>
    %322 = vector.broadcast %320 : vector<1x16x4xf32> to vector<2x16x4xf32>
    %323 = arith.mulf %321, %322 : vector<2x16x4xf32>
    %324 = arith.addf %314, %323 : vector<2x16x4xf32>
    %c0_8 = arith.constant 0 : index
    %c0_9 = arith.constant 0 : index
    %c0_10 = arith.constant 0 : index
    %325 = vector.load %arg4[%c0_8, %c0_9, %c0_10] : memref<2x16x4xf32, #tpu.memory_space<vmem>>, vector<2x16x4xf32>
    tpu.vector_store %arg4[%c0_8, %c0_9, %c0_10], %324 {strides = array<i32>} : memref<2x16x4xf32, #tpu.memory_space<vmem>>, vector<2x16x4xf32>,
    return
  }
  func.func @transform_0(%arg0: i32) -> (i32, i32, i32) {
    %c0_i32 = arith.constant 0 : i32
    %c0_i32_0 = arith.constant 0 : i32
    %c0_i32_1 = arith.constant 0 : i32
    return %c0_i32, %c0_i32_0, %arg0 : i32, i32, i32
  }
  func.func @transform_1(%arg0: i32) -> (i32, i32, i32) {
    %c0_i32 = arith.constant 0 : i32
    %c0_i32_0 = arith.constant 0 : i32
    %c0_i32_1 = arith.constant 0 : i32
    return %c0_i32, %c0_i32_0, %arg0 : i32, i32, i32
  }
  func.func @transform_2(%arg0: i32) -> (i32, i32, i32) {
    %c0_i32 = arith.constant 0 : i32
    %c0_i32_0 = arith.constant 0 : i32
    %c0_i32_1 = arith.constant 0 : i32
    return %c0_i32, %c0_i32_0, %arg0 : i32, i32, i32
  }
  func.func @transform_3(%arg0: i32) -> (i32, i32, i32) {
    %c0_i32 = arith.constant 0 : i32
    %c0_i32_0 = arith.constant 0 : i32
    %c0_i32_1 = arith.constant 0 : i32
    return %c0_i32, %c0_i32_0, %arg0 : i32, i32, i32
  }
}

</mosaic_0001>

<bundles_post_ra>
// kernel: tpu_custom_call.1
= control target key start
LH: loop header
LB: loop body
LE: loop exit
PB: predicated region body
PF: predicated region fallthrough
CT: control target
= control target key end

     0   :  { %v88_v0 = vlaneseq  ;;  %vm600_vm0 = vcmask 31744   ;;  %s1296_s0 = inlined_call_operand.vmem [shape: f32[2,32,4], index: 0, kind: input, shape index: {}]   ;;  %s1297_s1 = inlined_call_operand.vmem [shape: f32[32,16,4], index: 1, kind: input, shape index: {}]   ;;  %s1298_s2 = inlined_call_operand.vmem [shape: f32[1,16,4], index: 2, kind: input, shape index: {}]   ;;  %s1299_s3 = inlined_call_operand.vmem [shape: f32[2,16,4], index: 3, kind: output, shape index: {}]  }
   0x1   :  { %v632_v2 = vld [vmem:[%s1296_s0] sm:$0xff]  ;;  %v23_v8 = vld [vmem:[%s1297_s1 + $0x8] sm:$0xff]  ;;  %v24_v10 = vld [vmem:[%s1297_s1 + $0x10] sm:$0xff] }
   0x2   :  { %v89_v1 = vshrl.u32 %v88_v0, 7  ;;  %v637_v3 = vld [vmem:[%s1296_s0 + $0x20] sm:$0xff]  ;;  %v25_v11 = vld [vmem:[%s1297_s1 + $0x18] sm:$0xff]  ;;  %v27_v17 = vld [vmem:[%s1297_s1 + $0x28] sm:$0xff] }
   0x3   :  { %v22_v7 = vld [vmem:[%s1297_s1] sm:$0xff]  ;;  %v28_v22 = vld [vmem:[%s1297_s1 + $0x30] sm:$0xff]  ;;  %v29_v23 = vld [vmem:[%s1297_s1 + $0x38] sm:$0xff] }
   0x4   :  { %v639_v4 = vsub.s32 0, %v89_v1  ;;  %v641_v5 = vsub.s32 1, %v89_v1  ;;  %v643_v6 = vsub.s32 2, %v89_v1  ;;  %v651_v9 = vsub.s32 3, %v89_v1  ;;  %v26_v16 = vld [vmem:[%s1297_s1 + $0x20] sm:$0xff]  ;;  %v706_v32 = vld [vmem:[%s1296_s0 + $0x8] sm:$0xff] }
   0x5   :  { %v679_v21 = vsub.s32 4, %v89_v1  ;;  %v693_v27 = vsub.s32 5, %v89_v1  ;;  %v719_v37 = vld [vmem:[%s1296_s0 + $0x28] sm:$0xff]  ;;  %v30_v38 = vld [vmem:[%s1297_s1 + $0x40] sm:$0xff]  ;;  %v32_v44 = vld [vmem:[%s1297_s1 + $0x50] sm:$0xff]  ;;  %v751_v51 = vsub.s32 6, %v89_v1 }
   0x6   :  { %1304 = vst [vmem:[#allocation2_spill] sm:$0xff] %v651_v9  ;;  %v91_v12 = vrot.slane %v632_v2, %v639_v4  ;;  %v95_v13 = vrot.slane %v637_v3, %v639_v4  ;;  %v107_v14 = vrot.slane %v632_v2, %v641_v5  ;;  %v111_v15 = vrot.slane %v637_v3, %v641_v5  ;;  %v31_v39 = vld [vmem:[%s1297_s1 + $0x48] sm:$0xff]  ;;  %v33_v45 = vld [vmem:[%s1297_s1 + $0x58] sm:$0xff]  ;;  %v38_v54 = vld [vmem:[%s1297_s1 + $0x80] sm:$0xff] }
   0x7   :  { %v123_v18 = vrot.slane %v632_v2, %v643_v6  ;;  %v127_v19 = vrot.slane %v637_v3, %v643_v6  ;;  %v139_v20 = vrot.slane %v632_v2, %v651_v9  ;;  %v143_v26 = vrot.slane %v637_v3, %v651_v9  ;;  %1305 = vst [vmem:[#allocation3_spill] sm:$0xff] %v693_v27  ;;  %v39_v55 = vld [vmem:[%s1297_s1 + $0x88] sm:$0xff]  ;;  %v34_v60 = vld [vmem:[%s1297_s1 + $0x60] sm:$0xff] }
   0x8   :  { %v687_v24 = vmul.f32 %v91_v12, %v22_v7  ;;  %v689_v25 = vmul.f32 %v91_v12, %v23_v8  ;;  %v695_v28 = vmul.f32 %v95_v13, %v22_v7  ;;  %v697_v29 = vmul.f32 %v95_v13, %v23_v8  ;;  %v35_v61 = vld [vmem:[%s1297_s1 + $0x68] sm:$0xff]  ;;  %v36_v7 = vld [vmem:[%s1297_s1 + $0x70] sm:$0xff]  ;;  %v37_v8 = vld [vmem:[%s1297_s1 + $0x78] sm:$0xff] }
   0x9   :  { %v699_v30 = vmul.f32 %v107_v14, %v24_v10  ;;  %v701_v31 = vmul.f32 %v107_v14, %v25_v11  ;;  %v708_v33 = vmul.f32 %v111_v15, %v24_v10  ;;  %v710_v34 = vmul.f32 %v111_v15, %v25_v11 }
   0xa   :  { %v712_v35 = vmul.f32 %v123_v18, %v26_v16  ;;  %v714_v36 = vmul.f32 %v123_v18, %v27_v17  ;;  %v727_v40 = vmul.f32 %v127_v19, %v26_v16  ;;  %v729_v41 = vmul.f32 %v127_v19, %v27_v17 }
   0xb   :  { %v731_v42 = vmul.f32 %v139_v20, %v28_v22  ;;  %v733_v43 = vmul.f32 %v139_v20, %v29_v23  ;;  %v155_v46 = vrot.slane %v632_v2, %v679_v21  ;;  %v159_v47 = vrot.slane %v637_v3, %v679_v21 }
   0xc   :  { %v171_v48 = vrot.slane %v632_v2, %v693_v27  ;;  %v175_v49 = vrot.slane %v637_v3, %v693_v27  ;;  %v749_v50 = vmul.f32 %v143_v26, %v28_v22  ;;  %v753_v52 = vsub.s32 7, %v89_v1 }
   0xd   :  { %v219_v53 = vrot.slane %v706_v32, %v639_v4  ;;  %v763_v56 = vmul.f32 %v143_v26, %v29_v23  ;;  %v765_v57 = vmul.f32 %v155_v46, %v30_v38  ;;  %v767_v58 = vmul.f32 %v155_v46, %v31_v39 }
   0xe   :  { %v223_v59 = vrot.slane %v719_v37, %v639_v4  ;;  %v777_v62 = vmul.f32 %v159_v47, %v30_v38  ;;  %v779_v63 = vmul.f32 %v159_v47, %v31_v39  ;;  %v781_v0 = vmul.f32 %v171_v48, %v32_v44 }
   0xf   :  { %v783_v1 = vmul.f32 %v171_v48, %v33_v45  ;;  %v791_v10 = vmul.f32 %v175_v49, %v32_v44  ;;  %v187_v11 = vrot.slane %v632_v2, %v751_v51  ;;  %v191_v12 = vrot.slane %v637_v3, %v751_v51  ;;  %v42_v44 = vld [vmem:[%s1297_s1 + $0xa0] sm:$0xff] }
  0x10   :  { %v203_v13 = vrot.slane %v632_v2, %v753_v52  ;;  %v799_v14 = vmul.f32 %v175_v49, %v33_v45  ;;  %v207_v15 = vrot.slane %v637_v3, %v753_v52  ;;  %v803_v16 = vmul.f32 %v219_v53, %v38_v54  ;;  %v40_v2 = vld [vmem:[%s1297_s1 + $0x90] sm:$0xff]  ;;  %v41_v3 = vld [vmem:[%s1297_s1 + $0x98] sm:$0xff]  ;;  %v43_v45 = vld [vmem:[%s1297_s1 + $0xa8] sm:$0xff] }
  0x11   :  { %v805_v17 = vmul.f32 %v219_v53, %v39_v55  ;;  %v807_v18 = vmul.f32 %v187_v11, %v34_v60  ;;  %v809_v19 = vmul.f32 %v187_v11, %v35_v61  ;;  %v811_v20 = vmul.f32 %v223_v59, %v38_v54  ;;  %v44_v53 = vld [vmem:[%s1297_s1 + $0xb0] sm:$0xff]  ;;  %v45_v54 = vld [vmem:[%s1297_s1 + $0xb8] sm:$0xff]  ;;  %v46_v11 = vld [vmem:[%s1297_s1 + $0xc0] sm:$0xff] }
  0x12   :  { %1306 = vst [vmem:[#allocation4_spill] sm:$0xff] %v803_v16  ;;  %v813_v22 = vmul.f32 %v223_v59, %v39_v55  ;;  %v821_v23 = vmul.f32 %v191_v12, %v34_v60  ;;  %v823_v26 = vmul.f32 %v191_v12, %v35_v61  ;;  %v825_v38 = vmul.f32 %v203_v13, %v36_v7  ;;  %v47_v12 = vld [vmem:[%s1297_s1 + $0xc8] sm:$0xff] }
  0x13   :  { %1307 = vst [vmem:[#allocation5_spill] sm:$0xff] %v805_v17  ;;  %1308 = vst [vmem:[#allocation6_spill] sm:$0xff] %v811_v20  ;;  %v827_v39 = vmul.f32 %v203_v13, %v37_v8  ;;  %v235_v46 = vrot.slane %v706_v32, %v641_v5  ;;  %v239_v47 = vrot.slane %v719_v37, %v641_v5 }
  0x14   :  { %1309 = vst [vmem:[#allocation7_spill] sm:$0xff] %v813_v22  ;;  %1310 = vst [vmem:[#allocation8_spill] sm:$0xff] %v825_v38  ;;  %v251_v48 = vrot.slane %v706_v32, %v643_v6  ;;  %v255_v49 = vrot.slane %v719_v37, %v643_v6  ;;  %v849_v55 = vmul.f32 %v207_v15, %v36_v7 }
  0x15   :  { %1311 = vst [vmem:[#allocation9_spill] sm:$0xff] %v827_v39  ;;  %v267_v59 = vrot.slane %v706_v32, %v651_v9  ;;  %v271_v60 = vrot.slane %v719_v37, %v651_v9  ;;  %v283_v61 = vrot.slane %v706_v32, %v679_v21  ;;  %v863_v13 = vmul.f32 %v207_v15, %v37_v8 }
  0x16   :  { %1312 = vst [vmem:[#allocation10_spill] sm:$0xff] %v849_v55  ;;  %v865_v7 = vmul.f32 %v235_v46, %v40_v2  ;;  %v867_v22 = vmul.f32 %v235_v46, %v41_v3  ;;  %v287_v9 = vrot.slane %v719_v37, %v679_v21  ;;  %v871_v20 = vmul.f32 %v239_v47, %v40_v2  ;;  %v86_v46 = vld [vmem:[%s1298_s2] sm:$0xff]  ;;  %v87_v2 = vld [vmem:[%s1298_s2 + $0x8] sm:$0xff] }
  0x17   :  { %v873_v17 = vmul.f32 %v239_v47, %v41_v3  ;;  %v875_v16 = vmul.f32 %v251_v48, %v42_v44  ;;  %v877_v55 = vmul.f32 %v251_v48, %v43_v45  ;;  %v879_v39 = vmul.f32 %v255_v49, %v42_v44  ;;  %v48_v48 = vld [vmem:[%s1297_s1 + $0xd0] sm:$0xff] }
  0x18   :  { %v881_v38 = vmul.f32 %v255_v49, %v43_v45  ;;  %v883_v8 = vmul.f32 %v267_v59, %v44_v53  ;;  %v885_v15 = vmul.f32 %v267_v59, %v45_v54  ;;  %v893_v3 = vmul.f32 %v271_v60, %v44_v53  ;;  %v49_v49 = vld [vmem:[%s1297_s1 + $0xd8] sm:$0xff] }
  0x19   :  { %v895_v47 = vmul.f32 %v271_v60, %v45_v54  ;;  %v897_v44 = vmul.f32 %v283_v61, %v46_v11  ;;  %v899_v45 = vmul.f32 %v283_v61, %v47_v12  ;;  %v100_v59 = vadd.f32 %v687_v24, %v86_v46  ;;  %v50_v24 = vld [vmem:[%s1297_s1 + $0xe0] sm:$0xff] }
  0x1a   :  { %1313 = vst [vmem:[#allocation11_spill] sm:$0xff] %v885_v15  ;;  %1314 = vst [vmem:[#allocation12_spill] sm:$0xff] %v893_v3  ;;  %v101_v15 = vadd.f32 %v689_v25, %v87_v2  ;;  %v102_v53 = vadd.f32 %v695_v28, %v86_v46  ;;  %v103_v54 = vadd.f32 %v697_v29, %v87_v2  ;;  %v51_v25 = vld [vmem:[%s1297_s1 + $0xe8] sm:$0xff]  ;;  %v940_v3 = vld [vmem:[%s1296_s0 + $0x10] sm:$0xff] }
  0x1b   :  { %1315 = vst [vmem:[#allocation13_spill] sm:$0xff] %v895_v47  ;;  %1316 = vst [vmem:[#allocation14_spill] sm:$0xff] %v897_v44  ;;  %v911_v60 = vmul.f32 %v287_v9, %v46_v11  ;;  %v299_v61 = vrot.slane %v706_v32, %v693_v27  ;;  %v315_v44 = vrot.slane %v706_v32, %v751_v51 }
  0x1c   :  { %1317 = vst [vmem:[#allocation15_spill] sm:$0xff] %v899_v45  ;;  %v303_v45 = vrot.slane %v719_v37, %v693_v27  ;;  %v116_v28 = vadd.f32 %v699_v30, %v100_v59  ;;  %v117_v29 = vadd.f32 %v701_v31, %v101_v15  ;;  %v118_v11 = vadd.f32 %v708_v33, %v102_v53  ;;  %v957_v53 = vld [vmem:[%s1296_s0 + $0x30] sm:$0xff] }
  0x1d   :  { %1318 = vst [vmem:[#allocation16_spill] sm:$0xff] %v911_v60  ;;  %v119_v46 = vadd.f32 %v710_v34, %v103_v54  ;;  %v929_v2 = vmul.f32 %v287_v9, %v47_v12  ;;  %v931_v27 = vmul.f32 %v299_v61, %v48_v48  ;;  %v933_v60 = vmul.f32 %v299_v61, %v49_v49 }
  0x1e   :  { %v319_v47 = vrot.slane %v719_v37, %v751_v51  ;;  %v132_v30 = vadd.f32 %v712_v35, %v116_v28  ;;  %v133_v31 = vadd.f32 %v714_v36, %v117_v29  ;;  %v134_v33 = vadd.f32 %v727_v40, %v118_v11  ;;  %v52_v35 = vld [vmem:[%s1297_s1 + $0xf0] sm:$0xff]  ;;  %v53_v36 = vld [vmem:[%s1297_s1 + $0xf8] sm:$0xff] }
  0x1f   :  { %v135_v9 = vadd.f32 %v729_v41, %v119_v46  ;;  %v946_v34 = vmul.f32 %v303_v45, %v48_v48  ;;  %v948_v12 = vmul.f32 %v303_v45, %v49_v49  ;;  %v950_v15 = vmul.f32 %v315_v44, %v50_v24 }
  0x20   :  { %v952_v59 = vmul.f32 %v315_v44, %v51_v25  ;;  %v148_v40 = vadd.f32 %v731_v42, %v132_v30  ;;  %v149_v41 = vadd.f32 %v733_v43, %v133_v31  ;;  %v150_v44 = vadd.f32 %v749_v50, %v134_v33  ;;  %v54_v42 = vld [vmem:[%s1297_s1 + $0x100] sm:$0xff]  ;;  %v55_v43 = vld [vmem:[%s1297_s1 + $0x108] sm:$0xff]  ;;  %v56_v31 = vld [vmem:[%s1297_s1 + $0x110] sm:$0xff] }
  0x21   :  { %v151_v45 = vadd.f32 %v763_v56, %v135_v9  ;;  %v969_v48 = vmul.f32 %v319_v47, %v50_v24  ;;  %v331_v49 = vrot.slane %v706_v32, %v753_v52  ;;  %v335_v54 = vrot.slane %v719_v37, %v753_v52 }
  0x22   :  { %v347_v61 = vrot.slane %v940_v3, %v639_v4  ;;  %v164_v50 = vadd.f32 %v765_v57, %v148_v40  ;;  %v165_v56 = vadd.f32 %v767_v58, %v149_v41  ;;  %v166_v32 = vadd.f32 %v777_v62, %v150_v44  ;;  %v1320_v41 = vld [vmem:[#allocation9_spill] sm:$0xff] }
  0x23   :  { %v167_v24 = vadd.f32 %v779_v63, %v151_v45  ;;  %v987_v37 = vmul.f32 %v319_v47, %v51_v25  ;;  %v989_v28 = vmul.f32 %v331_v49, %v52_v35  ;;  %v991_v29 = vmul.f32 %v331_v49, %v53_v36  ;;  %v1321_v45 = vld [vmem:[#allocation10_spill] sm:$0xff] }
  0x24   :  { %v351_v11 = vrot.slane %v957_v53, %v639_v4  ;;  %v180_v46 = vadd.f32 %v781_v0, %v164_v50  ;;  %v181_v30 = vadd.f32 %v783_v1, %v165_v56  ;;  %v182_v57 = vadd.f32 %v791_v10, %v166_v32  ;;  %v57_v0 = vld [vmem:[%s1297_s1 + $0x118] sm:$0xff]  ;;  %v1322_v32 = vld [vmem:[#allocation4_spill] sm:$0xff] }
  0x25   :  { %v183_v58 = vadd.f32 %v799_v14, %v167_v24  ;;  %v999_v62 = vmul.f32 %v335_v54, %v52_v35  ;;  %v1001_v63 = vmul.f32 %v335_v54, %v53_v36  ;;  %v1003_v47 = vmul.f32 %v347_v61, %v54_v42 }
  0x26   :  { %v1005_v25 = vmul.f32 %v347_v61, %v55_v43  ;;  %v196_v1 = vadd.f32 %v807_v18, %v180_v46  ;;  %v197_v10 = vadd.f32 %v809_v19, %v181_v30  ;;  %v198_v14 = vadd.f32 %v821_v23, %v182_v57  ;;  %v58_v18 = vld [vmem:[%s1297_s1 + $0x120] sm:$0xff]  ;;  %v59_v19 = vld [vmem:[%s1297_s1 + $0x128] sm:$0xff]  ;;  %v1319_v23 = vld [vmem:[#allocation8_spill] sm:$0xff] }
  0x27   :  { %v199_v33 = vadd.f32 %v823_v26, %v183_v58  ;;  %v1017_v9 = vmul.f32 %v351_v11, %v54_v42  ;;  %v363_v35 = vrot.slane %v940_v3, %v641_v5  ;;  %v367_v36 = vrot.slane %v957_v53, %v641_v5  ;;  %v1323_v46 = vld [vmem:[#allocation5_spill] sm:$0xff]  ;;  %v1324_v57 = vld [vmem:[#allocation6_spill] sm:$0xff] }
  0x28   :  { %v379_v40 = vrot.slane %v940_v3, %v643_v6  ;;  %v212_v26 = vadd.f32 %v1319_v23, %v196_v1  ;;  %v213_v44 = vadd.f32 %v1320_v41, %v197_v10  ;;  %v214_v49 = vadd.f32 %v1321_v45, %v198_v14  ;;  %v1325_v1 = vld [vmem:[#allocation7_spill] sm:$0xff] }
  0x29   :  { %v215_v54 = vadd.f32 %v863_v13, %v199_v33  ;;  %v1035_v61 = vmul.f32 %v351_v11, %v55_v43  ;;  %v1037_v42 = vmul.f32 %v363_v35, %v56_v31  ;;  %v1039_v50 = vmul.f32 %v363_v35, %v57_v0  ;;  %v60_v33 = vld [vmem:[%s1297_s1 + $0x130] sm:$0xff]  ;;  %v61_v35 = vld [vmem:[%s1297_s1 + $0x138] sm:$0xff] }
  0x2a   :  { %v383_v56 = vrot.slane %v957_v53, %v643_v6  ;;  %v228_v24 = vadd.f32 %v1322_v32, %v212_v26  ;;  %v229_v30 = vadd.f32 %v1323_v46, %v213_v44  ;;  %v230_v58 = vadd.f32 %v1324_v57, %v214_v49  ;;  %v1327_v57 = vld [vmem:[#allocation11_spill] sm:$0xff] }
  0x2b   :  { %v231_v10 = vadd.f32 %v1325_v1, %v215_v54  ;;  %v1047_v14 = vmul.f32 %v367_v36, %v56_v31  ;;  %v1049_v13 = vmul.f32 %v367_v36, %v57_v0  ;;  %v1051_v43 = vmul.f32 %v379_v40, %v58_v18 }
  0x2c   :  { %v1053_v11 = vmul.f32 %v379_v40, %v59_v19  ;;  %v244_v23 = vadd.f32 %v865_v7, %v228_v24  ;;  %v245_v26 = vadd.f32 %v867_v22, %v229_v30  ;;  %v246_v31 = vadd.f32 %v871_v20, %v230_v58  ;;  %v1326_v40 = vld [vmem:[#allocation2_spill] sm:$0xff]  ;;  %v63_v20 = vld [vmem:[%s1297_s1 + $0x148] sm:$0xff] }
  0x2d   :  { %v247_v0 = vadd.f32 %v873_v17, %v231_v10  ;;  %v1065_v36 = vmul.f32 %v383_v56, %v58_v18  ;;  %v395_v41 = vrot.slane %v940_v3, %v1326_v40  ;;  %v399_v44 = vrot.slane %v957_v53, %v1326_v40  ;;  %v62_v7 = vld [vmem:[%s1297_s1 + $0x140] sm:$0xff] }
  0x2e   :  { %v411_v45 = vrot.slane %v940_v3, %v679_v21  ;;  %v260_v17 = vadd.f32 %v875_v16, %v244_v23  ;;  %v261_v22 = vadd.f32 %v877_v55, %v245_v26  ;;  %v262_v18 = vadd.f32 %v879_v39, %v246_v31  ;;  %v1328_v16 = vld [vmem:[#allocation12_spill] sm:$0xff]  ;;  %v1329_v55 = vld [vmem:[#allocation13_spill] sm:$0xff]  ;;  %v1330_v26 = vld [vmem:[#allocation14_spill] sm:$0xff] }
  0x2f   :  { %v263_v49 = vadd.f32 %v881_v38, %v247_v0  ;;  %v1083_v54 = vmul.f32 %v383_v56, %v59_v19  ;;  %v1085_v32 = vmul.f32 %v395_v41, %v60_v33  ;;  %v1087_v24 = vmul.f32 %v395_v41, %v61_v35  ;;  %v64_v23 = vld [vmem:[%s1297_s1 + $0x150] sm:$0xff]  ;;  %v1331_v0 = vld [vmem:[#allocation15_spill] sm:$0xff] }
  0x30   :  { %v415_v46 = vrot.slane %v957_v53, %v679_v21  ;;  %v276_v30 = vadd.f32 %v883_v8, %v260_v17  ;;  %v277_v58 = vadd.f32 %v1327_v57, %v261_v22  ;;  %v278_v1 = vadd.f32 %v1328_v16, %v262_v18  ;;  %v65_v8 = vld [vmem:[%s1297_s1 + $0x158] sm:$0xff]  ;;  %v67_v57 = vld [vmem:[%s1297_s1 + $0x168] sm:$0xff] }
  0x31   :  { %v279_v10 = vadd.f32 %v1329_v55, %v263_v49  ;;  %v1095_v39 = vmul.f32 %v399_v44, %v60_v33  ;;  %v1097_v38 = vmul.f32 %v399_v44, %v61_v35  ;;  %v1099_v19 = vmul.f32 %v411_v45, %v62_v7  ;;  %v1332_v33 = vld [vmem:[#allocation16_spill] sm:$0xff] }
  0x32   :  { %v1101_v56 = vmul.f32 %v411_v45, %v63_v20  ;;  %v292_v31 = vadd.f32 %v1330_v26, %v276_v30  ;;  %v293_v41 = vadd.f32 %v1331_v0, %v277_v58  ;;  %v294_v17 = vadd.f32 %v1332_v33, %v278_v1  ;;  %v1333_v45 = vld [vmem:[#allocation3_spill] sm:$0xff]  ;;  %v66_v30 = vld [vmem:[%s1297_s1 + $0x160] sm:$0xff]  ;;  %v1142_v0 = vld [vmem:[%s1296_s0 + $0x18] sm:$0xff] }
  0x33   :  { %v295_v35 = vadd.f32 %v929_v2, %v279_v10  ;;  %v1113_v44 = vmul.f32 %v415_v46, %v62_v7  ;;  %v427_v22 = vrot.slane %v940_v3, %v1333_v45  ;;  %v431_v18 = vrot.slane %v957_v53, %v1333_v45  ;;  %v1159_v33 = vld [vmem:[%s1296_s0 + $0x38] sm:$0xff] }
  0x34   :  { %v443_v49 = vrot.slane %v940_v3, %v751_v51  ;;  %v308_v2 = vadd.f32 %v931_v27, %v292_v31  ;;  %v309_v7 = vadd.f32 %v933_v60, %v293_v41  ;;  %v310_v58 = vadd.f32 %v946_v34, %v294_v17 }
  0x35   :  { %v311_v16 = vadd.f32 %v948_v12, %v295_v35  ;;  %v1131_v1 = vmul.f32 %v415_v46, %v63_v20  ;;  %v1133_v55 = vmul.f32 %v427_v22, %v64_v23  ;;  %v1135_v10 = vmul.f32 %v427_v22, %v65_v8 }
  0x36   :  { %v447_v26 = vrot.slane %v957_v53, %v751_v51  ;;  %v324_v27 = vadd.f32 %v950_v15, %v308_v2  ;;  %v325_v60 = vadd.f32 %v952_v59, %v309_v7  ;;  %v326_v34 = vadd.f32 %v969_v48, %v310_v58  ;;  %v68_v15 = vld [vmem:[%s1297_s1 + $0x170] sm:$0xff]  ;;  %v69_v59 = vld [vmem:[%s1297_s1 + $0x178] sm:$0xff] }
  0x37   :  { %v327_v12 = vadd.f32 %v987_v37, %v311_v16  ;;  %v1148_v20 = vmul.f32 %v431_v18, %v64_v23  ;;  %v1150_v46 = vmul.f32 %v431_v18, %v65_v8  ;;  %v1152_v31 = vmul.f32 %v443_v49, %v66_v30 }
  0x38   :  { %v1154_v41 = vmul.f32 %v443_v49, %v67_v57  ;;  %v340_v48 = vadd.f32 %v989_v28, %v324_v27  ;;  %v341_v37 = vadd.f32 %v991_v29, %v325_v60  ;;  %v342_v23 = vadd.f32 %v999_v62, %v326_v34  ;;  %v70_v28 = vld [vmem:[%s1297_s1 + $0x180] sm:$0xff]  ;;  %v71_v29 = vld [vmem:[%s1297_s1 + $0x188] sm:$0xff] }
  0x39   :  { %v343_v8 = vadd.f32 %v1001_v63, %v327_v12  ;;  %v1171_v17 = vmul.f32 %v447_v26, %v66_v30  ;;  %v459_v35 = vrot.slane %v940_v3, %v753_v52  ;;  %v463_v22 = vrot.slane %v957_v53, %v753_v52 }
  0x3a   :  { %v475_v18 = vrot.slane %v1142_v0, %v639_v4  ;;  %v356_v62 = vadd.f32 %v1003_v47, %v340_v48  ;;  %v357_v63 = vadd.f32 %v1005_v25, %v341_v37  ;;  %v358_v3 = vadd.f32 %v1017_v9, %v342_v23 }
  0x3b   :  { %v359_v49 = vadd.f32 %v1035_v61, %v343_v8  ;;  %v451_v53 = vmul.f32 %v447_v26, %v67_v57  ;;  %v464_v30 = vmul.f32 %v459_v35, %v68_v15  ;;  %v465_v2 = vmul.f32 %v459_v35, %v69_v59  ;;  %v72_v61 = vld [vmem:[%s1297_s1 + $0x190] sm:$0xff] }
  0x3c   :  { %v479_v7 = vrot.slane %v1159_v33, %v639_v4  ;;  %v372_v58 = vadd.f32 %v1037_v42, %v356_v62  ;;  %v373_v16 = vadd.f32 %v1039_v50, %v357_v63  ;;  %v374_v27 = vadd.f32 %v1047_v14, %v358_v3  ;;  %v73_v4 = vld [vmem:[%s1297_s1 + $0x198] sm:$0xff] }
  0x3d   :  { %v375_v47 = vadd.f32 %v1049_v13, %v359_v49  ;;  %v466_v60 = vmul.f32 %v463_v22, %v68_v15  ;;  %v467_v25 = vmul.f32 %v463_v22, %v69_v59  ;;  %v480_v34 = vmul.f32 %v475_v18, %v70_v28 }
  0x3e   :  { %v481_v9 = vmul.f32 %v475_v18, %v71_v29  ;;  %v388_v42 = vadd.f32 %v1051_v43, %v372_v58  ;;  %v389_v50 = vadd.f32 %v1053_v11, %v373_v16  ;;  %v390_v14 = vadd.f32 %v1065_v36, %v374_v27  ;;  %v74_v43 = vld [vmem:[%s1297_s1 + $0x1a0] sm:$0xff]  ;;  %v75_v11 = vld [vmem:[%s1297_s1 + $0x1a8] sm:$0xff] }
  0x3f   :  { %v391_v13 = vadd.f32 %v1083_v54, %v375_v47  ;;  %v482_v57 = vmul.f32 %v479_v7, %v70_v28  ;;  %v491_v26 = vrot.slane %v1142_v0, %v641_v5  ;;  %v495_v12 = vrot.slane %v1159_v33, %v641_v5 }
  0x40   :  { %v507_v15 = vrot.slane %v1142_v0, %v643_v6  ;;  %v404_v36 = vadd.f32 %v1085_v32, %v388_v42  ;;  %v405_v54 = vadd.f32 %v1087_v24, %v389_v50  ;;  %v406_v59 = vadd.f32 %v1095_v39, %v390_v14 }
  0x41   :  { %v407_v48 = vadd.f32 %v1097_v38, %v391_v13  ;;  %v483_v5 = vmul.f32 %v479_v7, %v71_v29  ;;  %v496_v37 = vmul.f32 %v491_v26, %v72_v61  ;;  %v497_v23 = vmul.f32 %v491_v26, %v73_v4  ;;  %v76_v38 = vld [vmem:[%s1297_s1 + $0x1b0] sm:$0xff] }
  0x42   :  { %v511_v8 = vrot.slane %v1159_v33, %v643_v6  ;;  %v420_v35 = vadd.f32 %v1099_v19, %v404_v36  ;;  %v421_v22 = vadd.f32 %v1101_v56, %v405_v54  ;;  %v422_v18 = vadd.f32 %v1113_v44, %v406_v59  ;;  %v77_v6 = vld [vmem:[%s1297_s1 + $0x1b8] sm:$0xff] }
  0x43   :  { %v423_v32 = vadd.f32 %v1131_v1, %v407_v48  ;;  %v498_v28 = vmul.f32 %v495_v12, %v72_v61  ;;  %v499_v24 = vmul.f32 %v495_v12, %v73_v4  ;;  %v512_v62 = vmul.f32 %v507_v15, %v74_v43 }
  0x44   :  { %v513_v39 = vmul.f32 %v507_v15, %v75_v11  ;;  %v436_v19 = vadd.f32 %v1133_v55, %v420_v35  ;;  %v437_v56 = vadd.f32 %v1135_v10, %v421_v22  ;;  %v438_v44 = vadd.f32 %v1148_v20, %v422_v18  ;;  %v78_v55 = vld [vmem:[%s1297_s1 + $0x1c0] sm:$0xff]  ;;  %v79_v10 = vld [vmem:[%s1297_s1 + $0x1c8] sm:$0xff] }
  0x45   :  { %v439_v1 = vadd.f32 %v1150_v46, %v423_v32  ;;  %v514_v29 = vmul.f32 %v511_v8, %v74_v43  ;;  %v523_v63 = vrot.slane %v1142_v0, %v1326_v40  ;;  %v527_v3 = vrot.slane %v1159_v33, %v1326_v40  ;;  %v82_v43 = vld [vmem:[%s1297_s1 + $0x1e0] sm:$0xff] }
  0x46   :  { %v539_v49 = vrot.slane %v1142_v0, %v679_v21  ;;  %v452_v20 = vadd.f32 %v1152_v31, %v436_v19  ;;  %v453_v46 = vadd.f32 %v1154_v41, %v437_v56  ;;  %v454_v7 = vadd.f32 %v1171_v17, %v438_v44  ;;  %v80_v31 = vld [vmem:[%s1297_s1 + $0x1d0] sm:$0xff]  ;;  %v81_v41 = vld [vmem:[%s1297_s1 + $0x1d8] sm:$0xff] }
  0x47   :  { %v455_v58 = vadd.f32 %v451_v53, %v439_v1  ;;  %v515_v16 = vmul.f32 %v511_v8, %v75_v11  ;;  %v528_v40 = vmul.f32 %v523_v63, %v76_v38  ;;  %v529_v27 = vmul.f32 %v523_v63, %v77_v6 }
  0x48   :  { %v543_v47 = vrot.slane %v1159_v33, %v679_v21  ;;  %v468_v61 = vadd.f32 %v464_v30, %v452_v20  ;;  %v469_v4 = vadd.f32 %v465_v2, %v453_v46  ;;  %v470_v42 = vadd.f32 %v466_v60, %v454_v7 }
  0x49   :  { %v471_v50 = vadd.f32 %v467_v25, %v455_v58  ;;  %v530_v14 = vmul.f32 %v527_v3, %v76_v38  ;;  %v531_v13 = vmul.f32 %v527_v3, %v77_v6  ;;  %v544_v26 = vmul.f32 %v539_v49, %v78_v55 }
  0x4a   :  { %v545_v12 = vmul.f32 %v539_v49, %v79_v10  ;;  %v484_v17 = vadd.f32 %v480_v34, %v468_v61  ;;  %v485_v53 = vadd.f32 %v481_v9, %v469_v4  ;;  %v486_v15 = vadd.f32 %v482_v57, %v470_v42  ;;  %v83_v34 = vld [vmem:[%s1297_s1 + $0x1e8] sm:$0xff] }
  0x4b   :  { %v487_v21 = vadd.f32 %v483_v5, %v471_v50  ;;  %v546_v30 = vmul.f32 %v543_v47, %v78_v55  ;;  %v555_v2 = vrot.slane %v1142_v0, %v1333_v45  ;;  %v559_v60 = vrot.slane %v1159_v33, %v1333_v45 }
  0x4c   :  { %v571_v25 = vrot.slane %v1142_v0, %v751_v51  ;;  %v500_v9 = vadd.f32 %v496_v37, %v484_v17  ;;  %v501_v57 = vadd.f32 %v497_v23, %v485_v53  ;;  %v502_v11 = vadd.f32 %v498_v28, %v486_v15  ;;  %v84_v37 = vld [vmem:[%s1297_s1 + $0x1f0] sm:$0xff]  ;;  %v85_v23 = vld [vmem:[%s1297_s1 + $0x1f8] sm:$0xff] }
  0x4d   :  { %v503_v36 = vadd.f32 %v499_v24, %v487_v21  ;;  %v547_v54 = vmul.f32 %v543_v47, %v79_v10  ;;  %v560_v59 = vmul.f32 %v555_v2, %v80_v31  ;;  %v561_v48 = vmul.f32 %v555_v2, %v81_v41 }
  0x4e   :  { %v575_v45 = vrot.slane %v1159_v33, %v751_v51  ;;  %v516_v5 = vadd.f32 %v512_v62, %v500_v9  ;;  %v517_v8 = vadd.f32 %v513_v39, %v501_v57  ;;  %v518_v35 = vadd.f32 %v514_v29, %v502_v11 }
  0x4f   :  { %v519_v22 = vadd.f32 %v515_v16, %v503_v36  ;;  %v562_v18 = vmul.f32 %v559_v60, %v80_v31  ;;  %v563_v32 = vmul.f32 %v559_v60, %v81_v41  ;;  %v576_v38 = vmul.f32 %v571_v25, %v82_v43 }
  0x50   :  { %v577_v6 = vmul.f32 %v571_v25, %v83_v34  ;;  %v532_v28 = vadd.f32 %v528_v40, %v516_v5  ;;  %v533_v24 = vadd.f32 %v529_v27, %v517_v8  ;;  %v534_v19 = vadd.f32 %v530_v14, %v518_v35 }
  0x51   :  { %v535_v51 = vadd.f32 %v531_v13, %v519_v22  ;;  %v578_v62 = vmul.f32 %v575_v45, %v82_v43  ;;  %v579_v39 = vmul.f32 %v575_v45, %v83_v34  ;;  %v587_v56 = vrot.slane %v1142_v0, %v753_v52 }
  0x52   :  { %v591_v44 = vrot.slane %v1159_v33, %v753_v52  ;;  %v548_v1 = vadd.f32 %v544_v26, %v532_v28  ;;  %v549_v29 = vadd.f32 %v545_v12, %v533_v24  ;;  %v550_v63 = vadd.f32 %v546_v30, %v534_v19 }
  0x53   :  { %v551_v3 = vadd.f32 %v547_v54, %v535_v51  ;;  %v592_v49 = vmul.f32 %v587_v56, %v84_v37  ;;  %v593_v55 = vmul.f32 %v587_v56, %v85_v23 }
  0x54   :  { %v594_v10 = vmul.f32 %v591_v44, %v84_v37  ;;  %v595_v20 = vmul.f32 %v591_v44, %v85_v23  ;;  %v564_v46 = vadd.f32 %v560_v59, %v548_v1  ;;  %v565_v7 = vadd.f32 %v561_v48, %v549_v29 }
  0x55   :  { %v566_v58 = vadd.f32 %v562_v18, %v550_v63  ;;  %v567_v16 = vadd.f32 %v563_v32, %v551_v3 }
  0x56   :  { %v580_v40 = vadd.f32 %v576_v38, %v564_v46  ;;  %v581_v27 = vadd.f32 %v577_v6, %v565_v7 }
  0x57   :  { %v582_v47 = vadd.f32 %v578_v62, %v566_v58  ;;  %v583_v61 = vadd.f32 %v579_v39, %v567_v16 }
  0x58   :  { %v596_v0 = vadd.f32 %v592_v49, %v580_v40  ;;  %v597_v4 = vadd.f32 %v593_v55, %v581_v27 }
  0x59   :  { %v598_v52 = vadd.f32 %v594_v10, %v582_v47  ;;  %v599_v33 = vadd.f32 %v595_v20, %v583_v61 }
  0x5a   :  { %601 = vst.msk [vmem:[%s1299_s3] sm:$0xff] %vm600_vm0, %v596_v0  ;;  %602 = vst.msk [vmem:[%s1299_s3 + $0x8] sm:$0xff] %vm600_vm0, %v597_v4 }
  0x5b   :  { %603 = vst.msk [vmem:[%s1299_s3 + $0x10] sm:$0xff] %vm600_vm0, %v598_v52  ;;  %604 = vst.msk [vmem:[%s1299_s3 + $0x18] sm:$0xff] %vm600_vm0, %v599_v33 }

</bundles_post_ra>
